<compile_context>
chip_gen: v7x
topology: tpu7x:2x2x1
jax: 0.10.0
libtpu: 0.0.40
codegen_flags: <defaults>
</compile_context>

<pallas_src>
import functools

import jax
import jax.numpy as jnp
from jax.experimental import pallas as pl
from jax.experimental.pallas import tpu as pltpu


LANES = 128  # pad the head output to a full lane-width slab


# ---------------------------------------------------------------------------
# Deterministic parameter init (mirrors weight_init: orthogonal W, zero bias)
# ---------------------------------------------------------------------------
def _orthogonal(key, out_dim, in_dim, gain=1.0):
    """Orthogonal init for a Linear weight of shape [out_dim, in_dim]."""
    rows, cols = out_dim, in_dim
    transpose = rows < cols
    n, m = (cols, rows) if transpose else (rows, cols)
    a = jax.random.normal(key, (n, m), jnp.float32)
    q, r = jnp.linalg.qr(a)
    q = q * jnp.sign(jnp.diagonal(r))          # make decomposition unique
    w = q.T if transpose else q                 # shape [rows, cols]
    return gain * w[:rows, :cols]


def init_soft_q_params(key, obs_dim, act_dim, hidden):
    """Weights stored pre-transposed [in, out]; matmul weights in bf16."""
    in_dim = obs_dim + act_dim
    k1, k2, k3 = jax.random.split(key, 3)

    w1 = _orthogonal(k1, hidden, in_dim).T                     # [in_dim, H]
    w1x = w1[:obs_dim].astype(jnp.bfloat16)                    # [OBS, H]
    w1a = w1[obs_dim:].astype(jnp.bfloat16)                    # [ACT, H]
    b1 = jnp.zeros((1, hidden), jnp.float32)

    w2 = _orthogonal(k2, hidden, hidden).T.astype(jnp.bfloat16)  # [H, H]
    b2 = jnp.zeros((1, hidden), jnp.float32)

    wh = _orthogonal(k3, 1, hidden).T                           # [H, 1]
    wh_pad = jnp.zeros((hidden, LANES), jnp.float32).at[:, :1].set(wh)
    wh_pad = wh_pad.astype(jnp.bfloat16)                        # [H, 128]
    bh_pad = jnp.zeros((1, LANES), jnp.float32)                 # [1, 128]

    return w1x, w1a, b1, w2, b2, wh_pad, bh_pad


# ---------------------------------------------------------------------------
# Pallas kernel: fused (concat -> Linear -> ReLU -> Linear -> ReLU -> head)
# Matmuls run bf16 x bf16 on the MXU with f32 accumulation; bias add / ReLU
# stay f32 (no bf16 VPU dependence, so it is correct+fast on v5e/v6e/v7x).
# ---------------------------------------------------------------------------
def q_mlp_kernel(x_ref, a_ref, w1x_ref, w1a_ref, b1_ref, w2_ref, b2_ref,
                 wh_ref, bh_ref, out_ref):
    bf16 = jnp.bfloat16
    # fused concat:  cat([x, a]) @ W1  ==  x @ W1x + a @ W1a
    h = jnp.dot(x_ref[...].astype(bf16), w1x_ref[...],
                preferred_element_type=jnp.float32)
    h = h + jnp.dot(a_ref[...].astype(bf16), w1a_ref[...],
                    preferred_element_type=jnp.float32)
    h = jnp.maximum(h + b1_ref[...], 0.0)

    h = jnp.dot(h.astype(bf16), w2_ref[...],
                preferred_element_type=jnp.float32)
    h = jnp.maximum(h + b2_ref[...], 0.0)

    # lane-dense head: N = 128 (only column 0 is meaningful)
    q = jnp.dot(h.astype(bf16), wh_ref[...],
                preferred_element_type=jnp.float32) + bh_ref[...]
    out_ref[...] = q.astype(out_ref.dtype)


def _round_up(n, m):
    return ((n + m - 1) // m) * m


def _pick_bm(batch):
    """Batch tile: big enough to feed the MXU, >=2 grid steps when possible."""
    b8 = _round_up(batch, 8)
    if b8 <= 64:
        return b8                                   # tiny batch -> single step
    return min(256, _round_up(pl.cdiv(b8, 2), 8))   # >=2 steps, tile <= 256


@functools.partial(jax.jit, static_argnames=("bm",))
def soft_q_forward(x, a, params, *, bm=None):
    """Q(x, a) -> [B, 1]. Tiles the batch dim; weights stay VMEM-resident."""
    B, obs_dim = x.shape
    _, act_dim = a.shape
    w1x, w1a, b1, w2, b2, wh, bh = params
    H = w1x.shape[1]

    if bm is None:
        bm = _pick_bm(B)
    grid = pl.cdiv(B, bm)
    B_pad = grid * bm
    if B_pad != B:                                   # zero-pad ragged batch
        x = jnp.pad(x, ((0, B_pad - B), (0, 0)))
        a = jnp.pad(a, ((0, B_pad - B), (0, 0)))

    grid_spec = pltpu.PrefetchScalarGridSpec(
        num_scalar_prefetch=0,
        grid=(grid,),
        in_specs=[
            pl.BlockSpec((bm, obs_dim), lambda i: (i, 0)),   # x batch tile
            pl.BlockSpec((bm, act_dim), lambda i: (i, 0)),   # a batch tile
            pl.BlockSpec((obs_dim, H), lambda i: (0, 0)),    # W1x (resident)
            pl.BlockSpec((act_dim, H), lambda i: (0, 0)),    # W1a
            pl.BlockSpec((1, H), lambda i: (0, 0)),          # b1
            pl.BlockSpec((H, H), lambda i: (0, 0)),          # W2
            pl.BlockSpec((1, H), lambda i: (0, 0)),          # b2
            pl.BlockSpec((H, LANES), lambda i: (0, 0)),      # Wh (padded)
            pl.BlockSpec((1, LANES), lambda i: (0, 0)),      # bh (padded)
        ],
        out_specs=pl.BlockSpec((bm, LANES), lambda i: (i, 0)),
    )

    D = obs_dim + act_dim
    flops = 2 * B_pad * (D * H + H * H + H * LANES)
    bytes_accessed = (
        x.size * 4 + a.size * 4                               # activations in
        + (w1x.size + w1a.size + w2.size + wh.size) * 2       # bf16 weights
        + (b1.size + b2.size + bh.size) * 4                   # f32 biases
        + B_pad * LANES * 4                                   # output slab
    )

    out = pl.pallas_call(
        q_mlp_kernel,
        out_shape=jax.ShapeDtypeStruct((B_pad, LANES), jnp.float32),
        grid_spec=grid_spec,
        compiler_params=pltpu.CompilerParams(
            dimension_semantics=("parallel",)),
        cost_estimate=pl.CostEstimate(
            flops=flops, transcendentals=0, bytes_accessed=bytes_accessed),
    )(x, a, w1x, w1a, b1, w2, b2, wh, bh)

    return out[:B, :1]


def soft_q_forward_ref(x, a, params):
    """Pure-JAX reference with matching bf16-matmul / f32-accumulate math."""
    w1x, w1a, b1, w2, b2, wh, bh = params
    bf16 = jnp.bfloat16
    h = (jnp.dot(x.astype(bf16), w1x, preferred_element_type=jnp.float32)
         + jnp.dot(a.astype(bf16), w1a, preferred_element_type=jnp.float32))
    h = jnp.maximum(h + b1, 0.0)
    h = jnp.maximum(
        jnp.dot(h.astype(bf16), w2, preferred_element_type=jnp.float32) + b2,
        0.0)
    q = jnp.dot(h.astype(bf16), wh, preferred_element_type=jnp.float32) + bh
    return q[:, :1]


if __name__ == "__main__":
    OBS, ACT, HID = 16, 8, 128

    key = jax.random.PRNGKey(0)
    kx, ka, kp, kx2, ka2 = jax.random.split(key, 5)
    params = init_soft_q_params(kp, OBS, ACT, HID)

    # Case 1: small batch (B = 8), single grid step.
    B1 = 8
    x1 = jax.random.normal(kx, (B1, OBS), jnp.float32)
    a1 = jax.random.normal(ka, (B1, ACT), jnp.float32)
    q1 = jax.block_until_ready(soft_q_forward(x1, a1, params))
    r1 = soft_q_forward_ref(x1, a1, params)
    assert q1.shape == (B1, 1)
    assert jnp.allclose(q1, r1, atol=2e-2, rtol=2e-2)

    # Case 2: ragged batch (B = 50) exercising cdiv + zero-padding path.
    B2 = 50
    x2 = jax.random.normal(kx2, (B2, OBS), jnp.float32)
    a2 = jax.random.normal(ka2, (B2, ACT), jnp.float32)
    q2 = jax.block_until_ready(soft_q_forward(x2, a2, params))
    r2 = soft_q_forward_ref(x2, a2, params)
    assert q2.shape == (B2, 1)
    assert jnp.allclose(q2, r2, atol=2e-2, rtol=2e-2)

    print("KERNEL_OK")
</pallas_src>

<mosaic_0001>
module attributes {stable_mosaic.version = 11 : i64} {
  func.func @q_mlp_kernel(%arg0: i32, %arg1: memref<8x16xf32, #tpu.memory_space<vmem>>, %arg2: memref<8x8xf32, #tpu.memory_space<vmem>>, %arg3: memref<16x128xbf16, #tpu.memory_space<vmem>>, %arg4: memref<8x128xbf16, #tpu.memory_space<vmem>>, %arg5: memref<1x128xf32, #tpu.memory_space<vmem>>, %arg6: memref<128x128xbf16, #tpu.memory_space<vmem>>, %arg7: memref<1x128xf32, #tpu.memory_space<vmem>>, %arg8: memref<128x128xbf16, #tpu.memory_space<vmem>>, %arg9: memref<1x128xf32, #tpu.memory_space<vmem>>, %arg10: memref<8x128xf32, #tpu.memory_space<vmem>>) attributes {dimension_semantics = [#tpu.dimension_semantics<parallel>], iteration_bounds = array<i64: 1>, scalar_prefetch = 0 : i64, scratch_operands = 0 : i64, tpu.core_type = #tpu.core_type<tc>, window_params = [{transform_indices = @transform_0, window_bounds = array<i64: 8, 16>}, {transform_indices = @transform_1, window_bounds = array<i64: 8, 8>}, {pipeline_mode = #tpu.pipeline_mode<synchronous>, transform_indices = @transform_2, window_bounds = array<i64: 16, 128>}, {pipeline_mode = #tpu.pipeline_mode<synchronous>, transform_indices = @transform_3, window_bounds = array<i64: 8, 128>}, {pipeline_mode = #tpu.pipeline_mode<synchronous>, transform_indices = @transform_4, window_bounds = array<i64: 1, 128>}, {pipeline_mode = #tpu.pipeline_mode<synchronous>, transform_indices = @transform_5, window_bounds = array<i64: 128, 128>}, {pipeline_mode = #tpu.pipeline_mode<synchronous>, transform_indices = @transform_6, window_bounds = array<i64: 1, 128>}, {pipeline_mode = #tpu.pipeline_mode<synchronous>, transform_indices = @transform_7, window_bounds = array<i64: 128, 128>}, {pipeline_mode = #tpu.pipeline_mode<synchronous>, transform_indices = @transform_8, window_bounds = array<i64: 1, 128>}, {transform_indices = @transform_9, window_bounds = array<i64: 8, 128>}]} {
    %c0 = arith.constant 0 : index
    %c0_0 = arith.constant 0 : index
    %0 = vector.load %arg1[%c0, %c0_0] : memref<8x16xf32, #tpu.memory_space<vmem>>, vector<8x16xf32>
    %1 = arith.truncf %0 : vector<8x16xf32> to vector<8x16xbf16>
    %c0_1 = arith.constant 0 : index
    %c0_2 = arith.constant 0 : index
    %2 = vector.load %arg3[%c0_1, %c0_2] : memref<16x128xbf16, #tpu.memory_space<vmem>>, vector<16x128xbf16>
    %cst = arith.constant dense<0.000000e+00> : vector<8x128xf32>
    %3 = tpu.matmul %1, %2, %cst {dimension_numbers = #tpu.dot_dimension_numbers<[1], [0], [0], [1], [0, 0, 1, 1], [], []>} : vector<8x16xbf16>, vector<16x128xbf16>, vector<8x128xf32> -> vector<8x128xf32>
    %c0_3 = arith.constant 0 : index
    %c0_4 = arith.constant 0 : index
    %4 = vector.load %arg2[%c0_3, %c0_4] : memref<8x8xf32, #tpu.memory_space<vmem>>, vector<8x8xf32>
    %5 = arith.truncf %4 : vector<8x8xf32> to vector<8x8xbf16>
    %c0_5 = arith.constant 0 : index
    %c0_6 = arith.constant 0 : index
    %6 = vector.load %arg4[%c0_5, %c0_6] : memref<8x128xbf16, #tpu.memory_space<vmem>>, vector<8x128xbf16>
    %cst_7 = arith.constant dense<0.000000e+00> : vector<8x128xf32>
    %7 = tpu.matmul %5, %6, %cst_7 {dimension_numbers = #tpu.dot_dimension_numbers<[1], [0], [0], [1], [0, 0, 1, 1], [], []>} : vector<8x8xbf16>, vector<8x128xbf16>, vector<8x128xf32> -> vector<8x128xf32>
    %8 = arith.addf %3, %7 : vector<8x128xf32>
    %c0_8 = arith.constant 0 : index
    %c0_9 = arith.constant 0 : index
    %9 = vector.load %arg5[%c0_8, %c0_9] : memref<1x128xf32, #tpu.memory_space<vmem>>, vector<1x128xf32>
    %10 = vector.broadcast %9 : vector<1x128xf32> to vector<8x128xf32>
    %11 = arith.addf %8, %10 : vector<8x128xf32>
    %cst_10 = arith.constant 0.000000e+00 : f32
    %12 = vector.broadcast %cst_10 : f32 to vector<8x128xf32>
    %13 = arith.maximumf %11, %12 : vector<8x128xf32>
    %14 = arith.truncf %13 : vector<8x128xf32> to vector<8x128xbf16>
    %c0_11 = arith.constant 0 : index
    %c0_12 = arith.constant 0 : index
    %15 = vector.load %arg6[%c0_11, %c0_12] : memref<128x128xbf16, #tpu.memory_space<vmem>>, vector<128x128xbf16>
    %cst_13 = arith.constant dense<0.000000e+00> : vector<8x128xf32>
    %16 = tpu.matmul %14, %15, %cst_13 {dimension_numbers = #tpu.dot_dimension_numbers<[1], [0], [0], [1], [0, 0, 1, 1], [], []>} : vector<8x128xbf16>, vector<128x128xbf16>, vector<8x128xf32> -> vector<8x128xf32>
    %c0_14 = arith.constant 0 : index
    %c0_15 = arith.constant 0 : index
    %17 = vector.load %arg7[%c0_14, %c0_15] : memref<1x128xf32, #tpu.memory_space<vmem>>, vector<1x128xf32>
    %18 = vector.broadcast %17 : vector<1x128xf32> to vector<8x128xf32>
    %19 = arith.addf %16, %18 : vector<8x128xf32>
    %cst_16 = arith.constant 0.000000e+00 : f32
    %20 = vector.broadcast %cst_16 : f32 to vector<8x128xf32>
    %21 = arith.maximumf %19, %20 : vector<8x128xf32>
    %22 = arith.truncf %21 : vector<8x128xf32> to vector<8x128xbf16>
    %c0_17 = arith.constant 0 : index
    %c0_18 = arith.constant 0 : index
    %23 = vector.load %arg8[%c0_17, %c0_18] : memref<128x128xbf16, #tpu.memory_space<vmem>>, vector<128x128xbf16>
    %cst_19 = arith.constant dense<0.000000e+00> : vector<8x128xf32>
    %24 = tpu.matmul %22, %23, %cst_19 {dimension_numbers = #tpu.dot_dimension_numbers<[1], [0], [0], [1], [0, 0, 1, 1], [], []>} : vector<8x128xbf16>, vector<128x128xbf16>, vector<8x128xf32> -> vector<8x128xf32>
    %c0_20 = arith.constant 0 : index
    %c0_21 = arith.constant 0 : index
    %25 = vector.load %arg9[%c0_20, %c0_21] : memref<1x128xf32, #tpu.memory_space<vmem>>, vector<1x128xf32>
    %26 = vector.broadcast %25 : vector<1x128xf32> to vector<8x128xf32>
    %27 = arith.addf %24, %26 : vector<8x128xf32>
    %c0_22 = arith.constant 0 : index
    %c0_23 = arith.constant 0 : index
    %28 = vector.load %arg10[%c0_22, %c0_23] : memref<8x128xf32, #tpu.memory_space<vmem>>, vector<8x128xf32>
    tpu.vector_store %arg10[%c0_22, %c0_23], %27 {strides = array<i32>} : memref<8x128xf32, #tpu.memory_space<vmem>>, vector<8x128xf32>,
    return
  }
  func.func @transform_0(%arg0: i32) -> (i32, i32) {
    %c0_i32 = arith.constant 0 : i32
    %c0_i32_0 = arith.constant 0 : i32
    return %arg0, %c0_i32 : i32, i32
  }
  func.func @transform_1(%arg0: i32) -> (i32, i32) {
    %c0_i32 = arith.constant 0 : i32
    %c0_i32_0 = arith.constant 0 : i32
    return %arg0, %c0_i32 : i32, i32
  }
  func.func @transform_2(%arg0: i32) -> (i32, i32) {
    %c0_i32 = arith.constant 0 : i32
    %c0_i32_0 = arith.constant 0 : i32
    %c0_i32_1 = arith.constant 0 : i32
    return %c0_i32, %c0_i32_0 : i32, i32
  }
  func.func @transform_3(%arg0: i32) -> (i32, i32) {
    %c0_i32 = arith.constant 0 : i32
    %c0_i32_0 = arith.constant 0 : i32
    %c0_i32_1 = arith.constant 0 : i32
    return %c0_i32, %c0_i32_0 : i32, i32
  }
  func.func @transform_4(%arg0: i32) -> (i32, i32) {
    %c0_i32 = arith.constant 0 : i32
    %c0_i32_0 = arith.constant 0 : i32
    %c0_i32_1 = arith.constant 0 : i32
    return %c0_i32, %c0_i32_0 : i32, i32
  }
  func.func @transform_5(%arg0: i32) -> (i32, i32) {
    %c0_i32 = arith.constant 0 : i32
    %c0_i32_0 = arith.constant 0 : i32
    %c0_i32_1 = arith.constant 0 : i32
    return %c0_i32, %c0_i32_0 : i32, i32
  }
  func.func @transform_6(%arg0: i32) -> (i32, i32) {
    %c0_i32 = arith.constant 0 : i32
    %c0_i32_0 = arith.constant 0 : i32
    %c0_i32_1 = arith.constant 0 : i32
    return %c0_i32, %c0_i32_0 : i32, i32
  }
  func.func @transform_7(%arg0: i32) -> (i32, i32) {
    %c0_i32 = arith.constant 0 : i32
    %c0_i32_0 = arith.constant 0 : i32
    %c0_i32_1 = arith.constant 0 : i32
    return %c0_i32, %c0_i32_0 : i32, i32
  }
  func.func @transform_8(%arg0: i32) -> (i32, i32) {
    %c0_i32 = arith.constant 0 : i32
    %c0_i32_0 = arith.constant 0 : i32
    %c0_i32_1 = arith.constant 0 : i32
    return %c0_i32, %c0_i32_0 : i32, i32
  }
  func.func @transform_9(%arg0: i32) -> (i32, i32) {
    %c0_i32 = arith.constant 0 : i32
    %c0_i32_0 = arith.constant 0 : i32
    return %arg0, %c0_i32 : i32, i32
  }
}

</mosaic_0001>

<bundles_post_ra>
// kernel: soft_q_forward.1
= control target key start
LH: loop header
LB: loop body
LE: loop exit
PB: predicated region body
PF: predicated region fallthrough
CT: control target
= control target key end

     0   :  { %14 = vsyncpa [#allocation3], 0  ;;  %s851_s0 = inlined_call_operand.hbm [shape: f32[8,16], index: 0, kind: input, shape index: {}]   ;;  %s852_s1 = inlined_call_operand.hbm [shape: f32[8,8], index: 1, kind: input, shape index: {}]   ;;  %s853_s2 = inlined_call_operand.hbm [shape: bf16[16,128], index: 2, kind: input, shape index: {}]   ;;  %s854_s3 = inlined_call_operand.vmem [shape: bf16[8,128], index: 3, kind: input, shape index: {}]   ;;  %s855_s4 = inlined_call_operand.vmem [shape: f32[1,128], index: 4, kind: input, shape index: {}]   ;;  %s856_s5 = inlined_call_operand.hbm [shape: bf16[128,128], index: 5, kind: input, shape index: {}]   ;;  %s857_s6 = inlined_call_operand.vmem [shape: f32[1,128], index: 6, kind: input, shape index: {}]   ;;  %s858_s7 = inlined_call_operand.hbm [shape: bf16[128,128], index: 7, kind: input, shape index: {}]   ;;  %s859_s8 = inlined_call_operand.vmem [shape: f32[1,128], index: 8, kind: input, shape index: {}]   ;;  %s860_s9 = inlined_call_operand.vmem [shape: f32[8,128], index: 9, kind: output, shape index: {}]  }
   0x1   :  { %15 = vsyncpa [#allocation5], 0 }
   0x2   :  { %16 = vsyncpa [#allocation8], 0  ;;  %s682_s30 = smov [#allocation4]   ;;  %s566_s13 = scalar_lea.hbm %s852_s1, 128 }
   0x3   :  { %s33_s10 = sshll.u32 %s682_s30, 4  ;;  %p567_p0 = scmp.ne.s32.totalorder %s852_s1, %s566_s13  ;;  %s34_s10 = int_to_ptr.vmem [resolvable:$true] %s33_s10 }
   0x4   :  { %p570_p1 = scmp.lt.u32.totalorder %s566_s13, %s852_s1 }
   0x6   :  { %p572_p2 = pnand %p570_p1, %p567_p0 }
   0x8   :  { %575 = shalt.err (!%p572_p2)
}
   0x9   :  { %s576_s18 = scalar_lea.vmem %s34_s10, 128  ;;  %p581_p4 = scmp.lt.s32.totalorder %s34_s10, %s34_s10 }
   0xa   :  { %p577_p3 = scmp.ne.s32.totalorder %s34_s10, %s576_s18  ;;  %p582_p5 = scmp.lt.s32.totalorder %s576_s18, %s576_s18 }
   0xc   :  { %p583_p6 = por %p582_p5, %p581_p4 }
   0xe   :  { %p584_p7 = pnand %p583_p6, %p577_p3 }
  0x10   :  { %587 = shalt.err (!%p584_p7)
}
  0x11   :  { %36 = dma.hbm_to_vmem [thread:$0]  %s852_s1, 128, %s34_s10, [#allocation5]  }
  0x12   :  { %s683_s21 = smov [#allocation7]   ;;  %s684_s23 = smov [#allocation2]  }
  0x13   :  { %s58_s22 = sshll.u32 %s683_s21, 4  ;;  %s23_s24 = sshll.u32 %s684_s23, 4  ;;  %s59_s22 = int_to_ptr.vmem [resolvable:$true] %s58_s22  ;;  %s24_s24 = int_to_ptr.vmem [resolvable:$true] %s23_s24 }
  0x14   :  { %s588_s27 = scalar_lea.hbm %s856_s5, 1024 }
  0x15   :  { %p589_p8 = scmp.ne.s32.totalorder %s856_s5, %s588_s27  ;;  %p592_p9 = scmp.lt.u32.totalorder %s588_s27, %s856_s5 }
  0x17   :  { %p594_p10 = pnand %p592_p9, %p589_p8 }
  0x19   :  { %597 = shalt.err (!%p594_p10)
}
  0x1a   :  { %s598_s1 = scalar_lea.vmem %s59_s22, 1024  ;;  %p603_p12 = scmp.lt.s32.totalorder %s59_s22, %s59_s22 }
  0x1b   :  { %p599_p11 = scmp.ne.s32.totalorder %s59_s22, %s598_s1  ;;  %p604_p13 = scmp.lt.s32.totalorder %s598_s1, %s598_s1 }
  0x1d   :  { %p605_p0 = por %p604_p13, %p603_p12 }
  0x1f   :  { %p606_p1 = pnand %p605_p0, %p599_p11 }
  0x21   :  { %609 = shalt.err (!%p606_p1)
}
  0x22   :  { %s685_s10 = smov 64   ;;  %s686_s12 = smov 4  }
  0x23   :  { %64 = dma.hbm_to_vmem [thread:$0]  %s856_s5, 1024, %s59_s22, [#allocation8], %s685_s10, %s685_s10, %s686_s12  }
  0x24   :  { %s610_s17 = scalar_lea.hbm %s851_s0, 128 }
  0x25   :  { %p611_p2 = scmp.ne.s32.totalorder %s851_s0, %s610_s17  ;;  %p614_p3 = scmp.lt.u32.totalorder %s610_s17, %s851_s0 }
  0x27   :  { %p616_p4 = pnand %p614_p3, %p611_p2 }
  0x29   :  { %619 = shalt.err (!%p616_p4)
}
  0x2a   :  { %s620_s23 = scalar_lea.vmem %s24_s24, 128  ;;  %p625_p6 = scmp.lt.s32.totalorder %s24_s24, %s24_s24 }
  0x2b   :  { %p621_p5 = scmp.ne.s32.totalorder %s24_s24, %s620_s23  ;;  %p626_p7 = scmp.lt.s32.totalorder %s620_s23, %s620_s23 }
  0x2d   :  { %p627_p8 = por %p626_p7, %p625_p6 }
  0x2f   :  { %p628_p9 = pnand %p627_p8, %p621_p5 }
  0x31   :  { %631 = shalt.err (!%p628_p9)
}
  0x32   :  { %26 = dma.hbm_to_vmem [thread:$0]  %s851_s0, 128, %s24_s24, [#allocation3]  }
  0x33   :  { %s687_s25 = smov [#allocation6]   ;;  %s688_s27 = smov [#allocation9]  }
  0x34   :  { %s42_s26 = sshll.u32 %s687_s25, 4  ;;  %s72_s28 = sshll.u32 %s688_s27, 4  ;;  %s43_s26 = int_to_ptr.vmem [resolvable:$true] %s42_s26  ;;  %s73_s28 = int_to_ptr.vmem [resolvable:$true] %s72_s28 }
  0x35   :  { %s632_s11 = scalar_lea.hbm %s853_s2, 128 }
  0x36   :  { %p633_p10 = scmp.ne.s32.totalorder %s853_s2, %s632_s11  ;;  %p636_p11 = scmp.lt.u32.totalorder %s632_s11, %s853_s2 }
  0x38   :  { %p638_p12 = pnand %p636_p11, %p633_p10 }
  0x3a   :  { %641 = shalt.err (!%p638_p12)
}
  0x3b   :  { %s642_s0 = scalar_lea.vmem %s43_s26, 128  ;;  %p647_p0 = scmp.lt.s32.totalorder %s43_s26, %s43_s26 }
  0x3c   :  { %p643_p13 = scmp.ne.s32.totalorder %s43_s26, %s642_s0  ;;  %p648_p1 = scmp.lt.s32.totalorder %s642_s0, %s642_s0 }
  0x3e   :  { %p649_p2 = por %p648_p1, %p647_p0 }
  0x40   :  { %p650_p3 = pnand %p649_p2, %p643_p13 }
  0x42   :  { %653 = shalt.err (!%p650_p3)
}
  0x43   :  { %48 = dma.hbm_to_vmem [thread:$0]  %s853_s2, 128, %s43_s26, [#allocation5], %s685_s10, %s685_s10, %s686_s12  }
  0x44   :  { %s654_s19 = scalar_lea.hbm %s858_s7, 1024 }
  0x45   :  { %p655_p4 = scmp.ne.s32.totalorder %s858_s7, %s654_s19  ;;  %p658_p5 = scmp.lt.u32.totalorder %s654_s19, %s858_s7 }
  0x47   :  { %p660_p6 = pnand %p658_p5, %p655_p4 }
  0x49   :  { %663 = shalt.err (!%p660_p6)
}
  0x4a   :  { %s664_s22 = scalar_lea.vmem %s73_s28, 1024  ;;  %p669_p8 = scmp.lt.s32.totalorder %s73_s28, %s73_s28 }
  0x4b   :  { %p665_p7 = scmp.ne.s32.totalorder %s73_s28, %s664_s22  ;;  %p670_p9 = scmp.lt.s32.totalorder %s664_s22, %s664_s22 }
  0x4d   :  { %p671_p10 = por %p670_p9, %p669_p8 }
  0x4f   :  { %p672_p11 = pnand %p671_p10, %p665_p7 }
  0x51   :  { %675 = shalt.err (!%p672_p11)
}
  0x52   :  { %78 = dma.hbm_to_vmem [thread:$0]  %s858_s7, 1024, %s73_s28, [#allocation8], %s685_s10, %s685_s10, %s686_s12  }
  0x53   :  { %676 = dma.done.wait [#allocation3], 128  }
  0x54   :  { %677 = vsyncadd [#allocation3], 4294967168 }
  0x55   :  { %678 = dma.done.wait [#allocation5], 256  }
  0x56   :  { %679 = vsyncadd [#allocation5], 4294967040 }
  0x57   :  { %680 = dma.done.wait [#allocation8], 2048  }
  0x58   :  { %681 = vsyncadd [#allocation8], 4294965248  ;;  %v689_v0 = vmov 0.0   ;;  %vm690_vm0 = vmmov 0   ;;  %vm108_vm1 = vcmask 1043456   ;;  %v549_v3 = vld [vmem:[#allocation6] sm:$0xff]  }
  0x59   :  { %488 = vmatprep.subr.bf16.mxu0 %v689_v0  ;;  %494 = vmatprep.subr.bf16.mxu1 %v689_v0  ;;  %v103_v1 = vld [vmem:[%s854_s3] sm:$0xf]  ;;  %v101_v4 = vld [vmem:[#allocation4] sm:$0xff]  ;;  %vm104_vm2 = vcmask 64512   ;;  %v550_v8 = vld [vmem:[#allocation7] sm:$0xff]   ;;  %vm158_vm3 = vcmask 130048  }
  0x5a   :  { %490 = vmatprep.mubr.msk.bf16.mxu0 %vm690_vm0, %v689_v0  ;;  %496 = vmatprep.mubr.msk.bf16.mxu1 %vm690_vm0, %v689_v0  ;;  %v110_v2 = vsel %vm108_vm1, %v103_v1, 0  ;;  %v97_v5 = vld [vmem:[#allocation2] sm:$0xff]  ;;  %v102_v6 = vpack.c.bf16 %v101_v4, %v101_v4  ;;  %v552_v10 = vld [vmem:[#allocation7 + $0x10] sm:$0xff]   ;;  %v553_v11 = vld [vmem:[#allocation7 + $0x18] sm:$0xff]  }
  0x5b   :  { %489 = vmatpush3.bf16.msra.mxu0 %v110_v2  ;;  %v98_v7 = vpack.c.bf16 %v97_v5, %v97_v5  ;;  %495 = vmatpush3.bf16.msra.mxu1 %v549_v3  ;;  %v551_v9 = vld [vmem:[#allocation7 + $0x8] sm:$0xff]   ;;  %v554_v12 = vld [vmem:[#allocation7 + $0x20] sm:$0xff]   ;;  %v556_v14 = vld [vmem:[#allocation7 + $0x30] sm:$0xff]  }
  0x5c   :  { %500 = vmatprep.subr.bf16.mxu0 %v689_v0  ;;  %520 = vmatprep.subr.bf16.mxu1 %v689_v0  ;;  %v555_v13 = vld [vmem:[#allocation7 + $0x28] sm:$0xff]   ;;  %v557_v15 = vld [vmem:[#allocation7 + $0x38] sm:$0xff]   ;;  %v558_v16 = vld [vmem:[#allocation9] sm:$0xff]  }
  0x5d   :  { %v559_v17 = vld [vmem:[#allocation9 + $0x8] sm:$0xff]   ;;  %v560_v18 = vld [vmem:[#allocation9 + $0x10] sm:$0xff]   ;;  %v561_v19 = vld [vmem:[#allocation9 + $0x18] sm:$0xff]  }
  0x5e   :  { %491 = vmatmul.mubr.msk.bf16.vlgmr.msra.gmra.mrb[0].mxu0 %vm104_vm2, %v102_v6  ;;  %497 = vmatmul.mubr.msk.bf16.vlgmr.msra.gmra.mrb[0].mxu1 %vm158_vm3, %v98_v7  ;;  %v562_v20 = vld [vmem:[#allocation9 + $0x20] sm:$0xff]   ;;  %v563_v21 = vld [vmem:[#allocation9 + $0x28] sm:$0xff]   ;;  %v564_v35 = vld [vmem:[#allocation9 + $0x30] sm:$0xff]  }
  0x5f   :  { %501 = vmatpush3.bf16.msra.mxu0 %v550_v8  ;;  %516 = vmatprep.mubr.msk.bf16.mxu0 %vm690_vm0, %v689_v0  ;;  %v447_v25 = vld [vmem:[%s855_s4] ss:$0 sm:$0xff]  ;;  %v565_v36 = vld [vmem:[#allocation9 + $0x38] sm:$0xff]  }
  0x60   :  { %502 = vmatprep.subr.bf16.mxu0 %v689_v0  ;;  %536 = vmatprep.mubr.msk.bf16.mxu1 %vm690_vm0, %v689_v0  ;;  %v448_v37 = vld [vmem:[%s857_s6] ss:$0 sm:$0xff] }
  0x61   :  { %521 = vmatpush3.bf16.msra.mxu1 %v558_v16  ;;  %v457_v45 = vld [vmem:[%s859_s8] ss:$0 sm:$0xff] }
  0x62   :  { %522 = vmatprep.subr.bf16.mxu1 %v689_v0 }
  0x63   :  { %503 = vmatpush3.bf16.msra.mxu0 %v551_v9 }
  0x64   :  { %504 = vmatprep.subr.bf16.mxu0 %v689_v0 }
  0x65   :  { %523 = vmatpush3.bf16.msra.mxu1 %v559_v17 }
  0x66   :  { %524 = vmatprep.subr.bf16.mxu1 %v689_v0 }
  0x67   :  { %505 = vmatpush3.bf16.msra.mxu0 %v552_v10 }
  0x68   :  { %506 = vmatprep.subr.bf16.mxu0 %v689_v0 }
  0x69   :  { %525 = vmatpush3.bf16.msra.mxu1 %v560_v18 }
  0x6a   :  { %526 = vmatprep.subr.bf16.mxu1 %v689_v0 }
  0x6b   :  { %507 = vmatpush3.bf16.msra.mxu0 %v553_v11 }
  0x6c   :  { %508 = vmatprep.subr.bf16.mxu0 %v689_v0 }
  0x6d   :  { %527 = vmatpush3.bf16.msra.mxu1 %v561_v19 }
  0x6e   :  { %528 = vmatprep.subr.bf16.mxu1 %v689_v0 }
  0x6f   :  { %509 = vmatpush3.bf16.msra.mxu0 %v554_v12 }
  0x70   :  { %510 = vmatprep.subr.bf16.mxu0 %v689_v0 }
  0x71   :  { %529 = vmatpush3.bf16.msra.mxu1 %v562_v20 }
  0x72   :  { %530 = vmatprep.subr.bf16.mxu1 %v689_v0 }
  0x73   :  { %511 = vmatpush3.bf16.msra.mxu0 %v555_v13 }
  0x74   :  { %512 = vmatprep.subr.bf16.mxu0 %v689_v0 }
  0x75   :  { %531 = vmatpush3.bf16.msra.mxu1 %v563_v21 }
  0x76   :  { %532 = vmatprep.subr.bf16.mxu1 %v689_v0 }
  0x77   :  { %513 = vmatpush3.bf16.msra.mxu0 %v556_v14 }
  0x78   :  { %514 = vmatprep.subr.bf16.mxu0 %v689_v0 }
  0x79   :  { %533 = vmatpush3.bf16.msra.mxu1 %v564_v35 }
  0x7a   :  { %534 = vmatprep.subr.bf16.mxu1 %v689_v0 }
  0x7b   :  { %515 = vmatpush3.bf16.msra.mxu0 %v557_v15 }
  0x7d   :  { %535 = vmatpush3.bf16.msra.mxu1 %v565_v36 }
 0x131   :  { %v146_v22 = vpop.f32.mrb[0].mxu0  ;;  %v196_v24 = vpop.f32.mrb[0].mxu1 }
 0x132   :  { %v492_v23 = vpop.f32.mrb[1].mxu0  ;;  %v197_v26 = vadd.f32 %v196_v24, %v146_v22  ;;  %v498_v28 = vpop.f32.mrb[1].mxu1 }
 0x133   :  { %v149_v27 = vpop.f32.mrb[2].mxu0  ;;  %v199_v30 = vpop.f32.mrb[2].mxu1 }
 0x134   :  { %v493_v29 = vpop.f32.mrb[3].mxu0  ;;  %v209_v31 = vadd.f32 %v447_v25, %v197_v26  ;;  %v499_v32 = vpop.f32.mrb[3].mxu1 }
 0x136   :  { %v210_v33 = vmax.f32 %v209_v31, 0.0 }
 0x138   :  { %v211_v34 = vpack.c.bf16 %v210_v33, %v210_v33 }
 0x13a   :  { %517 = vmatmul.mubr.bf16.vlgmr.msra.gmra.mrb[4].mxu0 %v211_v34 }
 0x20d   :  { %v317_v38 = vpop.f32.mrb[4].mxu0 }
 0x20e   :  { %v318_v39 = vadd.f32 %v448_v37, %v317_v38  ;;  %v518_v40 = vpop.f32.mrb[5].mxu0 }
 0x20f   :  { %v320_v41 = vpop.f32.mrb[6].mxu0 }
 0x210   :  { %v323_v42 = vmax.f32 %v318_v39, 0.0  ;;  %v519_v43 = vpop.f32.mrb[7].mxu0 }
 0x212   :  { %v324_v44 = vpack.c.bf16 %v323_v42, %v323_v42 }
 0x214   :  { %537 = vmatmul.mubr.bf16.vlgmr.msra.gmra.mrb[4].mxu1 %v324_v44 }
 0x2e7   :  { %v430_v46 = vpop.f32.mrb[4].mxu1 }
 0x2e8   :  { %v431_v47 = vadd.f32 %v457_v45, %v430_v46  ;;  %v538_v48 = vpop.f32.mrb[5].mxu1 }
 0x2e9   :  { %v433_v49 = vpop.f32.mrb[6].mxu1 }
 0x2ea   :  { %436 = vst [vmem:[%s860_s9] sm:$0xff] %v431_v47  ;;  %v539_v50 = vpop.f32.mrb[7].mxu1 }
 0x2eb   :  { %441 = vsyncpa [#allocation3], 1 }
 0x2ec   :  { %442 = vsyncpa [#allocation5], 1 }
 0x2ed   :  { %443 = vsyncpa [#allocation8], 1 }

</bundles_post_ra>
